<compile_context>
chip_gen: v5e
topology: v5e:2x2
jax: 0.10.0
libtpu: 0.0.40
codegen_flags: <defaults>
</compile_context>

<pallas_src>
import functools

import jax
import jax.numpy as jnp
import numpy as np
from jax.experimental import pallas as pl
from jax.experimental.pallas import tpu as pltpu


def _round_up(x, m):
    return (x + m - 1) // m * m


def _fit_rows(dim, tile):
    """Second-minor (sublane) dim: round to 8; single full block when it fits."""
    d8 = _round_up(dim, 8)
    if d8 <= tile:
        return d8, d8
    t = (tile // 8) * 8
    return t, _round_up(d8, t)


def _fit_lanes(dim, tile):
    """Minor (lane) dim: keep the exact dim as one full block when it fits,
    otherwise a 128-aligned tile with padding."""
    if dim <= tile:
        return dim, dim
    t = (tile // 128) * 128
    return t, _round_up(dim, t)


# ------------------------------ tiled matmul kernel (bf16 -> f32 acc) ------------------------------
def _matmul_kernel(x_ref, w_ref, o_ref, acc_ref):
    @pl.when(pl.program_id(2) == 0)
    def _():
        acc_ref[...] = jnp.zeros_like(acc_ref)

    acc_ref[...] += jnp.dot(x_ref[...], w_ref[...],
                            preferred_element_type=jnp.float32)

    @pl.when(pl.program_id(2) == pl.num_programs(2) - 1)
    def _():
        o_ref[...] = acc_ref[...].astype(o_ref.dtype)


def matmul_pallas(x, w, *, out_dtype=jnp.bfloat16, tm=256, tn=256, tk=512):
    """x: (M, K) @ w: (K, N) -> (M, N).  bf16 MXU path, f32 accumulation."""
    M, K = x.shape
    Kw, N = w.shape
    assert K == Kw
    x = x.astype(jnp.bfloat16)
    w = w.astype(jnp.bfloat16)
    tm, Mp = _fit_rows(M, tm)
    tk, Kp = _fit_lanes(K, tk)
    tn, Np = _fit_lanes(N, tn)
    xp = jnp.pad(x, ((0, Mp - M), (0, Kp - K)))   # identity when already aligned
    wp = jnp.pad(w, ((0, Kp - K), (0, Np - N)))
    out = pl.pallas_call(
        _matmul_kernel,
        out_shape=jax.ShapeDtypeStruct((Mp, Np), out_dtype),
        grid_spec=pltpu.PrefetchScalarGridSpec(
            num_scalar_prefetch=0,
            grid=(Mp // tm, Np // tn, Kp // tk),
            in_specs=[pl.BlockSpec((tm, tk), lambda i, j, k: (i, k)),
                      pl.BlockSpec((tk, tn), lambda i, j, k: (k, j))],
            out_specs=pl.BlockSpec((tm, tn), lambda i, j, k: (i, j)),
            scratch_shapes=[pltpu.VMEM((tm, tn), jnp.float32)]),
        compiler_params=pltpu.CompilerParams(
            dimension_semantics=("parallel", "parallel", "arbitrary")),
    )(xp, wp)
    return out[:M, :N]


# --------- fused attention: AC + (BD + rel_shift) + mask + softmax + AV, all heads per step ---------
def _rel_attn_body(q_ref, k_ref, v_ref, rk_ref, mask_ref, o_ref, *, n_head, d_head, rlen):
    qlen = q_ref.shape[1]
    klen = k_ref.shape[1]
    rpad = rk_ref.shape[1]                 # 128-aligned padded relative length (>= rlen)

    row = jax.lax.broadcasted_iota(jnp.int32, (qlen, klen), 0)
    col = jax.lax.broadcasted_iota(jnp.int32, (qlen, klen), 1)
    # positions where the flattened _rel_shift wraps into the next query row
    wrapped = (col - row) > (klen - qlen)
    masked = None if mask_ref is None else (mask_ref[...] != 0)

    dn = (((1,), (1,)), ((), ()))          # contract last dims -> no explicit transpose
    for h in range(n_head):                # static unroll over heads
        q = q_ref[h]                       # (qlen, d_head) bf16, softmax scale pre-folded
        ac = jax.lax.dot_general(q, k_ref[h], dn,
                                 preferred_element_type=jnp.float32)   # (qlen, klen)
        bd = jax.lax.dot_general(q, rk_ref[h], dn,
                                 preferred_element_type=jnp.float32)   # (qlen, rpad)

        # Exact Transformer-XL _rel_shift, fused in-kernel:
        #   shifted[i, k] = bd[i,     k + qlen - i]         if k + qlen - i <  rlen
        #                 = bd[i + 1, k + qlen - i - rlen]  otherwise
        # rot_a: row i rotated left by (qlen - i)  -> gives the non-wrapped branch.
        rot_a = pltpu.roll(bd, shift=rpad - qlen, axis=1, stride=1, stride_axis=0)
        # bd_nx[i] = bd[i + 1]  (row qlen-1 never contributes to the wrapped branch)
        bd_nx = pltpu.roll(bd, shift=qlen - 1, axis=0)
        # rot_b: wrapped branch, read from the *next* query row.
        rot_b = pltpu.roll(bd_nx, shift=rlen - qlen, axis=1, stride=1, stride_axis=0)
        bd_shift = jnp.where(wrapped, rot_b[:, :klen], rot_a[:, :klen])

        s = ac + bd_shift                  # scale already folded into q
        if masked is not None:
            s = jnp.where(masked, -jnp.inf, s)
        m = jnp.max(s, axis=-1, keepdims=True)
        e = jnp.exp(s - m)
        denom = jnp.sum(e, axis=-1, keepdims=True)
        p = (e * pl.reciprocal(denom, approx=True)).astype(v_ref.dtype)
        o = jnp.dot(p, v_ref[h], preferred_element_type=jnp.float32)   # (qlen, d_head)
        o_ref[:, h * d_head:(h + 1) * d_head] = o.astype(o_ref.dtype)


def _rel_attn_kernel_masked(q_ref, k_ref, v_ref, rk_ref, mask_ref, o_ref, *,
                            n_head, d_head, rlen):
    _rel_attn_body(q_ref, k_ref, v_ref, rk_ref, mask_ref, o_ref,
                   n_head=n_head, d_head=d_head, rlen=rlen)


def _rel_attn_kernel_nomask(q_ref, k_ref, v_ref, rk_ref, o_ref, *,
                            n_head, d_head, rlen):
    _rel_attn_body(q_ref, k_ref, v_ref, rk_ref, None, o_ref,
                   n_head=n_head, d_head=d_head, rlen=rlen)


def rel_attn_fused(q_bn, k_bn, v_bn, rk_pad, mask_i8, *, rlen):
    """q/k/v: (bsz, nh, {q,k}len, dh) bf16, rk_pad: (nh, rpad, dh) bf16 (zero-padded),
    mask_i8: (bsz, qlen, klen) int8 or None -> (bsz, qlen, nh*dh) bf16."""
    bsz, n_head, qlen, d_head = q_bn.shape
    klen = k_bn.shape[2]
    rpad = rk_pad.shape[1]

    in_specs = [
        pl.BlockSpec((None, n_head, qlen, d_head), lambda b: (b, 0, 0, 0)),
        pl.BlockSpec((None, n_head, klen, d_head), lambda b: (b, 0, 0, 0)),
        pl.BlockSpec((None, n_head, klen, d_head), lambda b: (b, 0, 0, 0)),
        pl.BlockSpec((n_head, rpad, d_head), lambda b: (0, 0, 0)),
    ]
    args = [q_bn, k_bn, v_bn, rk_pad]
    if mask_i8 is not None:
        in_specs.append(pl.BlockSpec((None, qlen, klen), lambda b: (b, 0, 0)))
        args.append(mask_i8)
        kernel = functools.partial(_rel_attn_kernel_masked,
                                   n_head=n_head, d_head=d_head, rlen=rlen)
    else:
        kernel = functools.partial(_rel_attn_kernel_nomask,
                                   n_head=n_head, d_head=d_head, rlen=rlen)

    return pl.pallas_call(
        kernel,
        out_shape=jax.ShapeDtypeStruct((bsz, qlen, n_head * d_head), jnp.bfloat16),
        grid_spec=pltpu.PrefetchScalarGridSpec(
            num_scalar_prefetch=0,
            grid=(bsz,),
            in_specs=in_specs,
            out_specs=pl.BlockSpec((None, qlen, n_head * d_head), lambda b: (b, 0, 0))),
        compiler_params=pltpu.CompilerParams(dimension_semantics=("parallel",)),
    )(*args)


# ------------------ o_net matmul with residual-add + LayerNorm fused into the epilogue ------------------
def _onet_ln_kernel(x_ref, w_ref, res_ref, g_ref, b_ref, o_ref, acc_ref, *, eps):
    @pl.when(pl.program_id(1) == 0)
    def _():
        acc_ref[...] = jnp.zeros_like(acc_ref)

    acc_ref[...] += jnp.dot(x_ref[...], w_ref[...],
                            preferred_element_type=jnp.float32)

    @pl.when(pl.program_id(1) == pl.num_programs(1) - 1)
    def _():
        z = acc_ref[...] + res_ref[...]
        mu = jnp.mean(z, axis=-1, keepdims=True)
        d = z - mu
        var = jnp.mean(d * d, axis=-1, keepdims=True)
        o_ref[...] = d * jax.lax.rsqrt(var + eps) * g_ref[...] + b_ref[...]


def onet_residual_layernorm_pallas(x, wT, res, gamma, beta, *, eps=1e-5, tm=256, tk=512):
    """(x @ wT + res) -> LayerNorm over the last dim.  x: (M, K) bf16, wT: (K, N) bf16,
    res: (M, N) f32 -> (M, N) f32.  N (= d_model) is kept un-tiled so the LN statistics
    are exact."""
    M, K = x.shape
    Kw, N = wT.shape
    assert K == Kw and res.shape == (M, N)
    x = x.astype(jnp.bfloat16)
    wT = wT.astype(jnp.bfloat16)
    res = res.astype(jnp.float32)
    tm, Mp = _fit_rows(M, tm)
    tk, Kp = _fit_lanes(K, tk)
    xp = jnp.pad(x, ((0, Mp - M), (0, Kp - K)))
    wp = jnp.pad(wT, ((0, Kp - K), (0, 0)))
    rp = jnp.pad(res, ((0, Mp - M), (0, 0)))
    out = pl.pallas_call(
        functools.partial(_onet_ln_kernel, eps=eps),
        out_shape=jax.ShapeDtypeStruct((Mp, N), jnp.float32),
        grid_spec=pltpu.PrefetchScalarGridSpec(
            num_scalar_prefetch=0,
            grid=(Mp // tm, Kp // tk),
            in_specs=[
                pl.BlockSpec((tm, tk), lambda i, k: (i, k)),
                pl.BlockSpec((tk, N), lambda i, k: (k, 0)),
                pl.BlockSpec((tm, N), lambda i, k: (i, 0)),
                pl.BlockSpec((1, N), lambda i, k: (0, 0)),
                pl.BlockSpec((1, N), lambda i, k: (0, 0)),
            ],
            out_specs=pl.BlockSpec((tm, N), lambda i, k: (i, 0)),
            scratch_shapes=[pltpu.VMEM((tm, N), jnp.float32)]),
        compiler_params=pltpu.CompilerParams(
            dimension_semantics=("parallel", "arbitrary")),
    )(xp, wp, rp, gamma.reshape(1, N).astype(jnp.float32),
      beta.reshape(1, N).astype(jnp.float32))
    return out[:M]


# ----------------------------------- forward -----------------------------------
def _build_mask(attn_mask, qlen, klen, bsz):
    """Replicate the PyTorch masked_fill broadcast as a (bsz, qlen, klen) int8 mask.
    (Skipping the `.any()` host check is numerically identical: an all-False mask is a
    no-op in the kernel's where().)  Returns None when there is no mask at all."""
    if attn_mask is None:
        return None
    m = attn_mask
    if m.ndim == 2:       # applied as mask[None, :, :, None] over (i, j, b, h) -> (klen, bsz)
        m = jnp.broadcast_to(m, (klen, bsz))
        m = jnp.broadcast_to(jnp.transpose(m, (1, 0))[:, None, :], (bsz, qlen, klen))
    elif m.ndim == 3:     # applied as mask[:, :, :, None] -> (qlen, klen, bsz)
        m = jnp.broadcast_to(m, (qlen, klen, bsz))
        m = jnp.transpose(m, (2, 0, 1))
    else:
        raise ValueError("attn_mask must be 2-D or 3-D")
    return m.astype(jnp.int8)


def rel_multihead_attn_forward(params, w, r, attn_mask=None, mems=None):
    """w: (qlen, bsz, d_model), r: (rlen, d_model) -> (qlen, bsz, d_model)."""
    n_head, d_head = params['n_head'], params['d_head']
    qlen, bsz, d_model = w.shape
    rlen = r.shape[0]
    scale = 1.0 / (d_head ** 0.5)

    qkv_wT = params['qkv_w'].T.astype(jnp.bfloat16)      # (d_model, 3*d_model)
    o_wT = params['o_w'].T.astype(jnp.bfloat16)          # (nh*dh, d_model)

    cat = w if mems is None else jnp.concatenate([mems, w], axis=0)
    klen = cat.shape[0]
    assert rlen == klen + 1, "RelMultiHeadAttn requires rlen == klen + 1"

    # qkv_net (LockedDropout == identity in eval mode); bf16 activations, f32 accumulation
    w_heads = matmul_pallas(cat.reshape(klen * bsz, d_model), qkv_wT)     # bf16
    r_heads = matmul_pallas(r, qkv_wT)                                    # bf16

    w_heads = w_heads.reshape(klen, bsz, 3, n_head, d_head)
    w_head_q = w_heads[-qlen:, :, 0]                     # (qlen, bsz, nh, dh)
    w_head_k = w_heads[:, :, 1]                          # (klen, bsz, nh, dh)
    w_head_v = w_heads[:, :, 2]
    r_heads = r_heads.reshape(rlen, 3, n_head, d_head)
    r_head_q = r_heads[:, 0]
    r_head_k = r_heads[:, 1]                             # (rlen, nh, dh)

    # rw_head_q == rr_head_q in the reference; fold the softmax scale into q so both the
    # AC and BD dots come out pre-scaled (one O(qlen*d_model) multiply instead of O(qlen*klen)).
    q = ((w_head_q.astype(jnp.float32) + r_head_q[-1].astype(jnp.float32)) * scale
         ).astype(jnp.bfloat16)

    q_bn = jnp.transpose(q, (1, 2, 0, 3))                # (bsz, nh, qlen, dh)
    k_bn = jnp.transpose(w_head_k, (1, 2, 0, 3))         # (bsz, nh, klen, dh)
    v_bn = jnp.transpose(w_head_v, (1, 2, 0, 3))
    rk_n = jnp.transpose(r_head_k, (1, 0, 2))            # (nh, rlen, dh)

    # Zero-pad the relative axis to a lane multiple so the in-kernel rel-shift rolls act on
    # 128-aligned lane dims (padded columns are never selected).
    rpad = _round_up(rlen, 128)
    rk_pad = jnp.pad(rk_n, ((0, 0), (0, rpad - rlen), (0, 0)))

    mask_i8 = _build_mask(attn_mask, qlen, klen, bsz)

    attn = rel_attn_fused(q_bn, k_bn, v_bn, rk_pad, mask_i8, rlen=rlen)   # (bsz, qlen, nh*dh)
    attn_vec = jnp.transpose(attn, (1, 0, 2)).reshape(qlen * bsz, n_head * d_head)

    # o_net + residual + LayerNorm fused (locked_drop == identity in eval mode)
    out = onet_residual_layernorm_pallas(
        attn_vec, o_wT, w.reshape(qlen * bsz, d_model).astype(jnp.float32),
        params['ln_g'], params['ln_b'], eps=1e-5)
    return out.reshape(qlen, bsz, d_model)


# ------------------------------ pure-JAX reference ------------------------------
def _rel_shift_ref(x):
    q0, r0 = x.shape[0], x.shape[1]
    x_padded = x.reshape(r0, q0, *x.shape[2:])
    return x_padded[1:].reshape(q0, r0 - 1, *x.shape[2:])


def ref_forward(params, w, r, attn_mask=None, mems=None):
    n_head, d_head = params['n_head'], params['d_head']
    qlen, bsz, d_model = w.shape
    rlen = r.shape[0]
    scale = 1.0 / (d_head ** 0.5)
    hp = jax.lax.Precision.HIGHEST

    cat = w if mems is None else jnp.concatenate([mems, w], axis=0)
    w_heads = jnp.einsum('lbd,ed->lbe', cat, params['qkv_w'], precision=hp)
    r_heads = jnp.einsum('ld,ed->le', r, params['qkv_w'], precision=hp)
    w_head_q, w_head_k, w_head_v = jnp.split(w_heads, 3, axis=-1)
    r_head_q, r_head_k, _ = jnp.split(r_heads, 3, axis=-1)
    w_head_q = w_head_q[-qlen:]
    klen = w_head_k.shape[0]

    w_head_q = w_head_q.reshape(qlen, bsz, n_head, d_head)
    w_head_k = w_head_k.reshape(klen, bsz, n_head, d_head)
    w_head_v = w_head_v.reshape(klen, bsz, n_head, d_head)
    r_head_q = r_head_q.reshape(rlen, n_head, d_head)
    r_head_k = r_head_k.reshape(rlen, n_head, d_head)

    rw_head_q = w_head_q + r_head_q[-1]
    AC = jnp.einsum('ibnd,jbnd->ijbn', rw_head_q, w_head_k, precision=hp)
    BD = jnp.einsum('ibnd,jnd->ijbn', rw_head_q, r_head_k, precision=hp)
    BD = _rel_shift_ref(BD)

    attn_score = (AC + BD) * scale
    if attn_mask is not None:
        if attn_mask.ndim == 2:
            attn_score = jnp.where(attn_mask[None, :, :, None], -jnp.inf, attn_score)
        elif attn_mask.ndim == 3:
            attn_score = jnp.where(attn_mask[:, :, :, None], -jnp.inf, attn_score)
    attn_prob = jax.nn.softmax(attn_score, axis=1)
    attn_vec = jnp.einsum('ijbn,jbnd->ibnd', attn_prob, w_head_v, precision=hp)
    attn_vec = attn_vec.reshape(qlen, bsz, n_head * d_head)
    attn_out = jnp.einsum('ibe,de->ibd', attn_vec, params['o_w'], precision=hp)

    pre = w + attn_out
    mu = pre.mean(-1, keepdims=True)
    var = ((pre - mu) ** 2).mean(-1, keepdims=True)
    return (pre - mu) * jax.lax.rsqrt(var + 1e-5) * params['ln_g'] + params['ln_b']


# ------------------------------------ params ------------------------------------
def init_params(key, n_head, d_model):
    d_head = d_model // n_head
    k1, k2, k3, k4 = jax.random.split(key, 4)
    qkv_w = 0.05 * jax.random.normal(k1, (3 * n_head * d_head, d_model), jnp.float32)
    o_w = 0.05 * jax.random.normal(k2, (d_model, n_head * d_head), jnp.float32)
    ln_g = 1.0 + 0.1 * jax.random.normal(k3, (d_model,), jnp.float32)
    ln_b = 0.1 * jax.random.normal(k4, (d_model,), jnp.float32)
    return dict(n_head=n_head, d_head=d_head, qkv_w=qkv_w, o_w=o_w,
                ln_g=ln_g, ln_b=ln_b)


# ------------------------------------- main -------------------------------------
if __name__ == "__main__":
    n_head, d_model = 4, 32
    qlen, bsz = 16, 2
    rlen = qlen + 1

    key = jax.random.PRNGKey(0)
    kp, kw, kr, km, kr2 = jax.random.split(key, 5)
    params = init_params(kp, n_head, d_model)
    w = jax.random.normal(kw, (qlen, bsz, d_model), jnp.float32)
    r = jax.random.normal(kr, (rlen, d_model), jnp.float32)

    # bf16 MXU path vs f32 HIGHEST-precision reference -> relaxed tolerance.
    TOL = dict(rtol=2e-2, atol=2e-2)

    # 3-D causal mask; True = masked out
    ii = jnp.arange(qlen)[:, None]
    jj = jnp.arange(qlen)[None, :]
    attn_mask = jnp.broadcast_to((jj > ii)[:, :, None], (qlen, qlen, bsz))

    out = jax.block_until_ready(
        rel_multihead_attn_forward(params, w, r, attn_mask=attn_mask))
    assert out.shape == (qlen, bsz, d_model)
    ref = ref_forward(params, w, r, attn_mask=attn_mask)
    np.testing.assert_allclose(np.asarray(out), np.asarray(ref), **TOL)

    # no-mask path (exercises the exact wrap-around values of the fused _rel_shift)
    out_nm = jax.block_until_ready(rel_multihead_attn_forward(params, w, r))
    ref_nm = ref_forward(params, w, r)
    np.testing.assert_allclose(np.asarray(out_nm), np.asarray(ref_nm), **TOL)

    # 2-D mask path (interpreted as (klen, bsz) via mask[None, :, :, None])
    mask2d = jnp.arange(qlen)[:, None] >= jnp.array([qlen - 3, qlen - 5])[None, :]
    out_2d = jax.block_until_ready(
        rel_multihead_attn_forward(params, w, r, attn_mask=mask2d))
    ref_2d = ref_forward(params, w, r, attn_mask=mask2d)
    np.testing.assert_allclose(np.asarray(out_2d), np.asarray(ref_2d), **TOL)

    # mems path (klen = mlen + qlen, rlen = klen + 1)
    mlen = 4
    mems = jax.random.normal(km, (mlen, bsz, d_model), jnp.float32)
    r2 = jax.random.normal(kr2, (qlen + mlen + 1, d_model), jnp.float32)
    out_m = jax.block_until_ready(
        rel_multihead_attn_forward(params, w, r2, mems=mems))
    ref_m = ref_forward(params, w, r2, mems=mems)
    np.testing.assert_allclose(np.asarray(out_m), np.asarray(ref_m), **TOL)

    print("KERNEL_OK")
</pallas_src>

<mosaic_0001>
module attributes {stable_mosaic.version = 11 : i64} {
  func.func @_matmul_kernel(%arg0: i32, %arg1: i32, %arg2: i32, %arg3: memref<32x32xbf16, #tpu.memory_space<vmem>>, %arg4: memref<32x96xbf16, #tpu.memory_space<vmem>>, %arg5: memref<32x96xbf16, #tpu.memory_space<vmem>>, %arg6: memref<32x96xf32, #tpu.memory_space<vmem>>) attributes {dimension_semantics = [#tpu.dimension_semantics<parallel>, #tpu.dimension_semantics<parallel>, #tpu.dimension_semantics<arbitrary>], iteration_bounds = array<i64: 1, 1, 1>, scalar_prefetch = 0 : i64, scratch_operands = 1 : i64, tpu.core_type = #tpu.core_type<tc>, window_params = [{transform_indices = @transform_0, window_bounds = array<i64: 32, 32>}, {transform_indices = @transform_1, window_bounds = array<i64: 32, 96>}, {transform_indices = @transform_2, window_bounds = array<i64: 32, 96>}]} {
    %c0_i32 = arith.constant 0 : i32
    %0 = arith.cmpi eq, %arg2, %c0_i32 : i32
    %1 = arith.extui %0 : i1 to i32
    %c0_i32_0 = arith.constant 0 : i32
    %2 = arith.cmpi ne, %1, %c0_i32_0 : i32
    scf.if %2 {
      %cst_10 = arith.constant 0.000000e+00 : f32
      %12 = vector.broadcast %cst_10 : f32 to vector<32x96xf32>
      %c0_11 = arith.constant 0 : index
      %c0_12 = arith.constant 0 : index
      %13 = vector.load %arg6[%c0_11, %c0_12] : memref<32x96xf32, #tpu.memory_space<vmem>>, vector<32x96xf32>
      tpu.vector_store %arg6[%c0_11, %c0_12], %12 {strides = array<i32>} : memref<32x96xf32, #tpu.memory_space<vmem>>, vector<32x96xf32>,
    } else {
    }
    %c0 = arith.constant 0 : index
    %c0_1 = arith.constant 0 : index
    %3 = vector.load %arg6[%c0, %c0_1] : memref<32x96xf32, #tpu.memory_space<vmem>>, vector<32x96xf32>
    %c0_2 = arith.constant 0 : index
    %c0_3 = arith.constant 0 : index
    %4 = vector.load %arg3[%c0_2, %c0_3] : memref<32x32xbf16, #tpu.memory_space<vmem>>, vector<32x32xbf16>
    %c0_4 = arith.constant 0 : index
    %c0_5 = arith.constant 0 : index
    %5 = vector.load %arg4[%c0_4, %c0_5] : memref<32x96xbf16, #tpu.memory_space<vmem>>, vector<32x96xbf16>
    %cst = arith.constant dense<0.000000e+00> : vector<32x96xf32>
    %6 = tpu.matmul %4, %5, %cst {dimension_numbers = #tpu.dot_dimension_numbers<[1], [0], [0], [1], [0, 0, 1, 1], [], []>} : vector<32x32xbf16>, vector<32x96xbf16>, vector<32x96xf32> -> vector<32x96xf32>
    %7 = arith.addf %3, %6 : vector<32x96xf32>
    %c0_6 = arith.constant 0 : index
    %c0_7 = arith.constant 0 : index
    %8 = vector.load %arg6[%c0_6, %c0_7] : memref<32x96xf32, #tpu.memory_space<vmem>>, vector<32x96xf32>
    tpu.vector_store %arg6[%c0_6, %c0_7], %7 {strides = array<i32>} : memref<32x96xf32, #tpu.memory_space<vmem>>, vector<32x96xf32>,
    %c0_i32_8 = arith.constant 0 : i32
    %9 = arith.cmpi eq, %arg2, %c0_i32_8 : i32
    %10 = arith.extui %9 : i1 to i32
    %c0_i32_9 = arith.constant 0 : i32
    %11 = arith.cmpi ne, %10, %c0_i32_9 : i32
    scf.if %11 {
      %c0_10 = arith.constant 0 : index
      %c0_11 = arith.constant 0 : index
      %12 = vector.load %arg6[%c0_10, %c0_11] : memref<32x96xf32, #tpu.memory_space<vmem>>, vector<32x96xf32>
      %13 = arith.truncf %12 : vector<32x96xf32> to vector<32x96xbf16>
      %c0_12 = arith.constant 0 : index
      %c0_13 = arith.constant 0 : index
      %14 = vector.load %arg5[%c0_12, %c0_13] : memref<32x96xbf16, #tpu.memory_space<vmem>>, vector<32x96xbf16>
      tpu.vector_store %arg5[%c0_12, %c0_13], %13 {strides = array<i32>} : memref<32x96xbf16, #tpu.memory_space<vmem>>, vector<32x96xbf16>,
    } else {
    }
    return
  }
  func.func @transform_0(%arg0: i32, %arg1: i32, %arg2: i32) -> (i32, i32) {
    %c0_i32 = arith.constant 0 : i32
    return %arg0, %arg2 : i32, i32
  }
  func.func @transform_1(%arg0: i32, %arg1: i32, %arg2: i32) -> (i32, i32) {
    %c0_i32 = arith.constant 0 : i32
    return %arg2, %arg1 : i32, i32
  }
  func.func @transform_2(%arg0: i32, %arg1: i32, %arg2: i32) -> (i32, i32) {
    %c0_i32 = arith.constant 0 : i32
    return %arg0, %arg1 : i32, i32
  }
}

</mosaic_0001>

<bundles_post_ra>
// kernel: tpu_custom_call.1
= control target key start
LH: loop header
LB: loop body
LE: loop exit
PB: predicated region body
PF: predicated region fallthrough
CT: control target
= control target key end

     0   :  { %7 = vsyncpa [#allocation4], 0  ;;  %s318_s0 = inlined_call_operand.hbm [shape: bf16[32,32], index: 0, kind: input, shape index: {}]   ;;  %s319_s1 = inlined_call_operand.hbm [shape: bf16[32,96], index: 1, kind: input, shape index: {}]   ;;  %s320_s2 = inlined_call_operand.hbm [shape: bf16[32,96], index: 2, kind: output, shape index: {}]  }
   0x1   :  { %8 = vsyncpa [#allocation7], 0 }
   0x2   :  { %9 = vsyncpa [#allocation5], 0  ;;  %s14_s11 = sshll.u32 %s318_s0, 4  ;;  %s267_s12 = smov [#allocation3]   ;;  %s15_s11 = int_to_ptr.hbm [resolvable:$true] %s14_s11 }
   0x3   :  { %s16_s13 = sshll.u32 %s267_s12, 4  ;;  %s27_s16 = sshll.u32 %s319_s1, 4  ;;  %s17_s13 = int_to_ptr.vmem [resolvable:$true] %s16_s13  ;;  %s28_s16 = int_to_ptr.hbm [resolvable:$true] %s27_s16 }
   0x4   :  { %s268_s17 = smov 64   ;;  %s269_s18 = smov 4  }
   0x5   :  { %22 = dma.hbm_to_vmem [thread:$0]  %s15_s11, 256, %s17_s13, [#allocation4], %s268_s17, %s268_s17, %s269_s18  }
   0x6   :  { %s270_s19 = smov [#allocation6]  }
   0x7   :  { %s29_s20 = sshll.u32 %s270_s19, 4  ;;  %s30_s20 = int_to_ptr.vmem [resolvable:$true] %s29_s20 }
   0x8   :  { %35 = dma.hbm_to_vmem [thread:$0]  %s28_s16, 256, %s30_s20, [#allocation7], %s268_s17, %s268_s17, %s269_s18  }
   0x9   :  { %261 = dma.done.wait [#allocation4], 256  }
   0xa   :  { %262 = vsyncadd [#allocation4], 4294967040 }
   0xb   :  { %263 = dma.done.wait [#allocation7], 256  }
   0xc   :  { %264 = vsyncadd [#allocation7], 4294967040  ;;  %vm49_vm0 = vcmask 785408   ;;  %v271_v0 = vmov 0.0   ;;  %v180_v1 = vld [vmem:[#allocation6 + $0x8] sm:$0xff]  ;;  %v179_v2 = vld [vmem:[#allocation6] sm:$0xff] }
   0xd   :  { %50 = vst.msk [vmem:[#allocation2] sm:$0xff] %vm49_vm0, %v271_v0  ;;  %101 = vmatpush.bf16.msra.mxu0 %v180_v1  ;;  %181 = vmatpush.bf16.msra.mxu1 %v180_v1  ;;  %v177_v3 = vld [vmem:[#allocation3] sm:$0xff]  ;;  %v178_v4 = vld [vmem:[#allocation3 + $0x8] sm:$0xff]  ;;  %vm88_vm1 = vcmask 261120   ;;  %vm134_vm2 = vcmask 781312   ;;  %s272_s0 = smov [#allocation8]  }
   0xe   :  { %51 = vst.msk [vmem:[#allocation2 + $0x8] sm:$0xff] %vm49_vm0, %v271_v0  ;;  %s143_s1 = sshll.u32 %s272_s0, 4  ;;  %s145_s23 = sshll.u32 %s320_s2, 4  ;;  %s144_s1 = int_to_ptr.vmem [resolvable:$true] %s143_s1  ;;  %s146_s23 = int_to_ptr.hbm [resolvable:$true] %s145_s23 }
   0xf   :  { %52 = vst.msk [vmem:[#allocation2 + $0x10] sm:$0xff] %vm49_vm0, %v271_v0 }
  0x10   :  { %53 = vst.msk [vmem:[#allocation2 + $0x18] sm:$0xff] %vm49_vm0, %v271_v0 }
  0x11   :  { %102 = vmatpush.bf16.msra.mxu0 %v179_v2  ;;  %182 = vmatpush.bf16.msra.mxu1 %v179_v2 }
  0x14   :  { %175 = vmatmul.msk.bf16.vlgmr.msra.gmra.mxu0 %vm88_vm1, %v177_v3  ;;  %176 = vmatmul.msk.bf16.vlgmr.msra.gmra.mxu1 %vm88_vm1, %v178_v4  ;;  %v54_v5 = vld [vmem:[#allocation2] sm:$0xff] }
  0x15   :  { %v55_v11 = vld [vmem:[#allocation2 + $0x8] sm:$0xff] }
  0x16   :  { %v56_v6 = vld [vmem:[#allocation2 + $0x10] sm:$0xff] }
  0x17   :  { %v57_v12 = vld [vmem:[#allocation2 + $0x18] sm:$0xff] }
  0x91   :  { %v104_v7 = vpop.f32.mrf.mxu0  ;;  %v109_v8 = vpop.f32.mrf.mxu1 }
  0x92   :  { %v114_v9 = vadd.f32 %v104_v7, %v54_v5  ;;  %v116_v10 = vadd.f32 %v109_v8, %v56_v6 }
  0x94   :  { %119 = vst.msk [vmem:[#allocation2] sm:$0xff] %vm49_vm0, %v114_v9 }
  0x95   :  { %121 = vst.msk [vmem:[#allocation2 + $0x10] sm:$0xff] %vm49_vm0, %v116_v10 }
  0x99   :  { %v106_v13 = vpop.f32.mrf.mxu0  ;;  %v111_v14 = vpop.f32.mrf.mxu1 }
  0x9a   :  { %v115_v15 = vadd.f32 %v106_v13, %v55_v11  ;;  %v117_v16 = vadd.f32 %v111_v14, %v57_v12 }
  0x9b   :  { %v126_v17 = vld [vmem:[#allocation2] sm:$0xff] }
  0x9c   :  { %120 = vst.msk [vmem:[#allocation2 + $0x8] sm:$0xff] %vm49_vm0, %v115_v15  ;;  %v128_v18 = vld [vmem:[#allocation2 + $0x10] sm:$0xff]  ;;  %v130_v19 = vpack.c.bf16 %v126_v17, %v126_v17 }
  0x9d   :  { %122 = vst.msk [vmem:[#allocation2 + $0x18] sm:$0xff] %vm49_vm0, %v117_v16  ;;  %v132_v20 = vpack.c.bf16 %v128_v18, %v128_v18 }
  0x9e   :  { %135 = vst.msk [vmem:[#allocation8] sm:$0xf] %vm134_vm2, %v130_v19 }
  0x9f   :  { %137 = vst.msk [vmem:[#allocation8 + $0x8] sm:$0xf] %vm134_vm2, %v132_v20 }
  0xa3   :  { %v127_v21 = vld [vmem:[#allocation2 + $0x8] sm:$0xff] }
  0xa4   :  { %v129_v22 = vld [vmem:[#allocation2 + $0x18] sm:$0xff]  ;;  %v131_v23 = vpack.c.bf16 %v127_v21, %v127_v21 }
  0xa5   :  { %v133_v24 = vpack.c.bf16 %v129_v22, %v129_v22 }
  0xa6   :  { %136 = vst.msk [vmem:[#allocation8 + $0x4] sm:$0xf] %vm134_vm2, %v131_v23 }
  0xa7   :  { %138 = vst.msk [vmem:[#allocation8 + $0xc] sm:$0xf] %vm134_vm2, %v133_v24 }
  0xa8   :  { %151 = dma.vmem_to_hbm [thread:$0]  %s144_s1, 256, %s146_s23, [#allocation5], %s268_s17, %s268_s17, %s269_s18  }
  0xa9   :  { %265 = dma.done.wait [#allocation5], 256  }
  0xaa   :  { %266 = vsyncadd [#allocation5], 4294967040 }
  0xab   :  { %156 = vsyncpa [#allocation4], 1 }
  0xac   :  { %157 = vsyncpa [#allocation7], 1 }
  0xad   :  { %158 = vsyncpa [#allocation5], 1 }

</bundles_post_ra>
